<compile_context>
chip_gen: v7x
topology: tpu7x:2x2x1
jax: 0.10.0
libtpu: 0.0.40
codegen_flags: <defaults>
</compile_context>

<pallas_src>
import jax
import jax.numpy as jnp
from jax.experimental import pallas as pl
from jax.experimental.pallas import tpu as pltpu


def _round_up(x, m):
    return ((x + m - 1) // m) * m


def input_to_hidden_pallas(x, w1, b1, w2, b2, hid_dim, hist_length, *,
                           rows_per_step=4096, use_bf16=True, out_dtype=None,
                           vmem_budget_bytes=12 * 1024 * 1024):
    """Pallas TPU implementation of InputToHidden.forward.

    x : (batch, num_node, in_dim) float32
    w1: (in_dim, hid_dim)         b1: (1, hid_dim)
    w2: (hid_dim, hid_dim*hist)   b2: (1, hid_dim*hist)
    Returns (num_node, hist_length, batch, hid_dim), matching the PyTorch
    `tohidden(x).reshape(b, n, hist, hid).permute(1, 2, 0, 3)`.
    """
    batch, num_node, in_dim = x.shape
    out_dim = hid_dim * hist_length
    assert w1.shape == (in_dim, hid_dim), w1.shape
    assert w2.shape == (hid_dim, out_dim), w2.shape
    out_dtype = out_dtype if out_dtype is not None else x.dtype
    mm_dtype = jnp.bfloat16 if use_bf16 else jnp.float32
    itemsize_out = jnp.dtype(out_dtype).itemsize

    # ---- node-tile selection --------------------------------------------
    # Each grid step processes all `batch` rows of `tn` nodes (= batch*tn
    # token rows).  Big tiles amortize the ~0.35us/grid-step overhead; the
    # VMEM budget (double-buffered x-in + out-out, with lane/sublane padding)
    # keeps us under every generation's scoped-VMEM default.
    x_bytes_per_node = batch * _round_up(in_dim, 128) * 4          # f32, lane-padded
    o_bytes_per_node = (_round_up(hist_length, 8)
                        * _round_up(batch * hid_dim, 128) * itemsize_out)
    per_node = 2 * (x_bytes_per_node + o_bytes_per_node)           # double buffered
    tn_vmem = max(1, vmem_budget_bytes // per_node)
    tn_rows = max(1, rows_per_step // max(1, batch))
    if num_node <= 8:
        tn = num_node                      # block == full node dim, always legal
    else:
        tn = min(num_node, tn_vmem, tn_rows)
        tn = max(8, (tn // 8) * 8)         # sublane-aligned tile
    num_node_pad = pl.cdiv(num_node, tn) * tn

    if num_node_pad != num_node:
        # Padded nodes compute garbage and are sliced off afterwards.
        x = jnp.pad(x, ((0, 0), (0, num_node_pad - num_node), (0, 0)))
    grid = (num_node_pad // tn,)

    # Weights/biases are tiny; cast once in the wrapper.  x stays f32 and is
    # cast inside the kernel.
    w1c = w1.astype(mm_dtype)
    w2c = w2.astype(mm_dtype)
    b1c = b1.reshape(1, hid_dim).astype(jnp.float32)
    b2c = b2.reshape(1, out_dim).astype(jnp.float32)

    def kernel(x_ref, w1_ref, b1_ref, w2_ref, b2_ref, o_ref):
        # x_ref: (batch, tn, in_dim) f32
        # o_ref: (tn, hist_length, batch*hid_dim)
        w1v = w1_ref[...]
        w2v = w2_ref[...]
        b1v = b1_ref[...]
        b2v = b2_ref[...]
        # Static unroll over batch (assumes a modest batch; for very large
        # batch one would additionally tile the batch axis on the grid).
        for b in range(batch):
            xb = x_ref[b].astype(mm_dtype)                     # in-kernel cast
            h = jnp.dot(xb, w1v, preferred_element_type=jnp.float32) + b1v
            h = jnp.maximum(h, 0.0)                            # f32 ReLU (VPU)
            r = jnp.dot(h.astype(mm_dtype), w2v,
                        preferred_element_type=jnp.float32) + b2v
            r = r.astype(o_ref.dtype)                          # (tn, hist*hid)
            for t in range(hist_length):
                # out[node, t, b, :] = r[:, t*hid:(t+1)*hid]
                o_ref[:, t, b * hid_dim:(b + 1) * hid_dim] = (
                    r[:, t * hid_dim:(t + 1) * hid_dim])

    flops = 2 * batch * num_node_pad * (in_dim * hid_dim + hid_dim * out_dim)
    bytes_accessed = (
        x.size * x.dtype.itemsize
        + w1c.size * w1c.dtype.itemsize + w2c.size * w2c.dtype.itemsize
        + b1c.size * 4 + b2c.size * 4
        + num_node_pad * hist_length * batch * hid_dim * itemsize_out)

    out3 = pl.pallas_call(
        kernel,
        out_shape=jax.ShapeDtypeStruct(
            (num_node_pad, hist_length, batch * hid_dim), out_dtype),
        grid_spec=pltpu.PrefetchScalarGridSpec(
            num_scalar_prefetch=0,
            grid=grid,
            in_specs=[
                # Streamed activations: the only block whose index changes.
                pl.BlockSpec((batch, tn, in_dim), lambda i: (0, i, 0)),
                # Grid-invariant params: full-array blocks, constant index map
                # -> fetched once, VMEM-resident across all grid steps.
                pl.BlockSpec((in_dim, hid_dim), lambda i: (0, 0)),
                pl.BlockSpec((1, hid_dim), lambda i: (0, 0)),
                pl.BlockSpec((hid_dim, out_dim), lambda i: (0, 0)),
                pl.BlockSpec((1, out_dim), lambda i: (0, 0)),
            ],
            out_specs=pl.BlockSpec((tn, hist_length, batch * hid_dim),
                                   lambda i: (i, 0, 0)),
        ),
        compiler_params=pltpu.CompilerParams(
            dimension_semantics=("parallel",),
            vmem_limit_bytes=32 * 1024 * 1024),
        cost_estimate=pl.CostEstimate(
            flops=flops, transcendentals=0, bytes_accessed=bytes_accessed),
    )(x, w1c, b1c, w2c, b2c)

    if num_node_pad != num_node:
        out3 = out3[:num_node]
    # FREE reshape: (node, hist, batch*hid) -> (node, hist, batch, hid).
    return out3.reshape(num_node, hist_length, batch, hid_dim)


if __name__ == "__main__":
    # Module hyperparameters (small, consistent with the forward pass).
    in_dim = 16
    hid_dim = 32
    step_size = 1
    back = 4
    hist_length = int(back / step_size)  # 4

    batch = 2
    num_node = 8

    key = jax.random.PRNGKey(0)
    k_x, k_w1, k_b1, k_w2, k_b2 = jax.random.split(key, 5)

    bound1 = 1.0 / (in_dim ** 0.5)
    bound2 = 1.0 / (hid_dim ** 0.5)
    w1 = jax.random.uniform(k_w1, (in_dim, hid_dim), jnp.float32, -bound1, bound1)
    b1 = jax.random.uniform(k_b1, (1, hid_dim), jnp.float32, -bound1, bound1)
    w2 = jax.random.uniform(
        k_w2, (hid_dim, hid_dim * hist_length), jnp.float32, -bound2, bound2)
    b2 = jax.random.uniform(
        k_b2, (1, hid_dim * hist_length), jnp.float32, -bound2, bound2)

    x = jax.random.normal(k_x, (batch, num_node, in_dim), jnp.float32)

    out = input_to_hidden_pallas(x, w1, b1, w2, b2, hid_dim, hist_length)
    out = jax.block_until_ready(out)
    assert out.shape == (num_node, hist_length, batch, hid_dim), out.shape

    # Reference 1: same bf16-operand / f32-accumulate math in plain JAX.
    xb = x.reshape(-1, in_dim).astype(jnp.bfloat16)
    w1b = w1.astype(jnp.bfloat16)
    w2b = w2.astype(jnp.bfloat16)
    h_ref = jnp.maximum(
        jnp.dot(xb, w1b, preferred_element_type=jnp.float32) + b1, 0.0)
    ref = jnp.dot(h_ref.astype(jnp.bfloat16), w2b,
                  preferred_element_type=jnp.float32) + b2
    ref = jnp.transpose(
        ref.reshape(batch, num_node, hist_length, hid_dim), (1, 2, 0, 3))
    assert jnp.allclose(out, ref, atol=1e-4, rtol=1e-4), "bf16-consistent mismatch"

    # Reference 2: full-f32 math (sanity check on the bf16 operand cast).
    h32 = jnp.maximum(x.reshape(-1, in_dim) @ w1 + b1, 0.0)
    ref32 = jnp.transpose(
        (h32 @ w2 + b2).reshape(batch, num_node, hist_length, hid_dim),
        (1, 2, 0, 3))
    assert jnp.allclose(out, ref32, atol=5e-2, rtol=5e-2), "f32 sanity mismatch"

    # TODO(synk): self.norm (BatchNorm2d) is declared in __init__ but never
    # applied in forward, so it is intentionally not implemented.
    print("KERNEL_OK")
</pallas_src>

<mosaic_0001>
module attributes {stable_mosaic.version = 11 : i64} {
  func.func @kernel(%arg0: i32, %arg1: memref<2x8x16xf32, #tpu.memory_space<vmem>>, %arg2: memref<16x32xbf16, #tpu.memory_space<vmem>>, %arg3: memref<1x32xf32, #tpu.memory_space<vmem>>, %arg4: memref<32x128xbf16, #tpu.memory_space<vmem>>, %arg5: memref<1x128xf32, #tpu.memory_space<vmem>>, %arg6: memref<8x4x64xf32, #tpu.memory_space<vmem>>) attributes {dimension_semantics = [#tpu.dimension_semantics<parallel>], iteration_bounds = array<i64: 1>, scalar_prefetch = 0 : i64, scratch_operands = 0 : i64, tpu.core_type = #tpu.core_type<tc>, window_params = [{transform_indices = @transform_0, window_bounds = array<i64: 2, 8, 16>}, {pipeline_mode = #tpu.pipeline_mode<synchronous>, transform_indices = @transform_1, window_bounds = array<i64: 16, 32>}, {pipeline_mode = #tpu.pipeline_mode<synchronous>, transform_indices = @transform_2, window_bounds = array<i64: 1, 32>}, {pipeline_mode = #tpu.pipeline_mode<synchronous>, transform_indices = @transform_3, window_bounds = array<i64: 32, 128>}, {pipeline_mode = #tpu.pipeline_mode<synchronous>, transform_indices = @transform_4, window_bounds = array<i64: 1, 128>}, {transform_indices = @transform_5, window_bounds = array<i64: 8, 4, 64>}]} {
    %c0 = arith.constant 0 : index
    %c0_0 = arith.constant 0 : index
    %0 = vector.load %arg2[%c0, %c0_0] : memref<16x32xbf16, #tpu.memory_space<vmem>>, vector<16x32xbf16>
    %c0_1 = arith.constant 0 : index
    %c0_2 = arith.constant 0 : index
    %1 = vector.load %arg4[%c0_1, %c0_2] : memref<32x128xbf16, #tpu.memory_space<vmem>>, vector<32x128xbf16>
    %c0_3 = arith.constant 0 : index
    %c0_4 = arith.constant 0 : index
    %2 = vector.load %arg3[%c0_3, %c0_4] : memref<1x32xf32, #tpu.memory_space<vmem>>, vector<1x32xf32>
    %c0_5 = arith.constant 0 : index
    %c0_6 = arith.constant 0 : index
    %3 = vector.load %arg5[%c0_5, %c0_6] : memref<1x128xf32, #tpu.memory_space<vmem>>, vector<1x128xf32>
    %c0_7 = arith.constant 0 : index
    %c0_8 = arith.constant 0 : index
    %c0_9 = arith.constant 0 : index
    %4 = vector.load %arg1[%c0_7, %c0_8, %c0_9] : memref<2x8x16xf32, #tpu.memory_space<vmem>>, vector<1x8x16xf32>
    %5 = vector.shape_cast %4 : vector<1x8x16xf32> to vector<8x16xf32>
    %6 = arith.truncf %5 : vector<8x16xf32> to vector<8x16xbf16>
    %cst = arith.constant dense<0.000000e+00> : vector<8x32xf32>
    %7 = tpu.matmul %6, %0, %cst {dimension_numbers = #tpu.dot_dimension_numbers<[1], [0], [0], [1], [0, 0, 1, 1], [], []>} : vector<8x16xbf16>, vector<16x32xbf16>, vector<8x32xf32> -> vector<8x32xf32>
    %8 = vector.broadcast %2 : vector<1x32xf32> to vector<8x32xf32>
    %9 = arith.addf %7, %8 : vector<8x32xf32>
    %cst_10 = arith.constant 0.000000e+00 : f32
    %10 = vector.broadcast %cst_10 : f32 to vector<8x32xf32>
    %11 = arith.maximumf %9, %10 : vector<8x32xf32>
    %12 = arith.truncf %11 : vector<8x32xf32> to vector<8x32xbf16>
    %cst_11 = arith.constant dense<0.000000e+00> : vector<8x128xf32>
    %13 = tpu.matmul %12, %1, %cst_11 {dimension_numbers = #tpu.dot_dimension_numbers<[1], [0], [0], [1], [0, 0, 1, 1], [], []>} : vector<8x32xbf16>, vector<32x128xbf16>, vector<8x128xf32> -> vector<8x128xf32>
    %14 = vector.broadcast %3 : vector<1x128xf32> to vector<8x128xf32>
    %15 = arith.addf %13, %14 : vector<8x128xf32>
    %16 = vector.extract_strided_slice %15 {offsets = [0, 0], sizes = [8, 32], strides = [1, 1]} : vector<8x128xf32> to vector<8x32xf32>
    %c0_12 = arith.constant 0 : index
    %c0_13 = arith.constant 0 : index
    %c0_14 = arith.constant 0 : index
    %17 = vector.load %arg6[%c0_12, %c0_13, %c0_14] : memref<8x4x64xf32, #tpu.memory_space<vmem>>, vector<8x1x32xf32>
    %18 = vector.shape_cast %17 : vector<8x1x32xf32> to vector<8x32xf32>
    %19 = vector.shape_cast %16 : vector<8x32xf32> to vector<8x1x32xf32>
    tpu.vector_store %arg6[%c0_12, %c0_13, %c0_14], %19 {strides = array<i32>} : memref<8x4x64xf32, #tpu.memory_space<vmem>>, vector<8x1x32xf32>,
    %20 = vector.extract_strided_slice %15 {offsets = [0, 32], sizes = [8, 32], strides = [1, 1]} : vector<8x128xf32> to vector<8x32xf32>
    %c0_15 = arith.constant 0 : index
    %c1 = arith.constant 1 : index
    %c0_16 = arith.constant 0 : index
    %21 = vector.load %arg6[%c0_15, %c1, %c0_16] : memref<8x4x64xf32, #tpu.memory_space<vmem>>, vector<8x1x32xf32>
    %22 = vector.shape_cast %21 : vector<8x1x32xf32> to vector<8x32xf32>
    %23 = vector.shape_cast %20 : vector<8x32xf32> to vector<8x1x32xf32>
    tpu.vector_store %arg6[%c0_15, %c1, %c0_16], %23 {strides = array<i32>} : memref<8x4x64xf32, #tpu.memory_space<vmem>>, vector<8x1x32xf32>,
    %24 = vector.extract_strided_slice %15 {offsets = [0, 64], sizes = [8, 32], strides = [1, 1]} : vector<8x128xf32> to vector<8x32xf32>
    %c0_17 = arith.constant 0 : index
    %c2 = arith.constant 2 : index
    %c0_18 = arith.constant 0 : index
    %25 = vector.load %arg6[%c0_17, %c2, %c0_18] : memref<8x4x64xf32, #tpu.memory_space<vmem>>, vector<8x1x32xf32>
    %26 = vector.shape_cast %25 : vector<8x1x32xf32> to vector<8x32xf32>
    %27 = vector.shape_cast %24 : vector<8x32xf32> to vector<8x1x32xf32>
    tpu.vector_store %arg6[%c0_17, %c2, %c0_18], %27 {strides = array<i32>} : memref<8x4x64xf32, #tpu.memory_space<vmem>>, vector<8x1x32xf32>,
    %28 = vector.extract_strided_slice %15 {offsets = [0, 96], sizes = [8, 32], strides = [1, 1]} : vector<8x128xf32> to vector<8x32xf32>
    %c0_19 = arith.constant 0 : index
    %c3 = arith.constant 3 : index
    %c0_20 = arith.constant 0 : index
    %29 = vector.load %arg6[%c0_19, %c3, %c0_20] : memref<8x4x64xf32, #tpu.memory_space<vmem>>, vector<8x1x32xf32>
    %30 = vector.shape_cast %29 : vector<8x1x32xf32> to vector<8x32xf32>
    %31 = vector.shape_cast %28 : vector<8x32xf32> to vector<8x1x32xf32>
    tpu.vector_store %arg6[%c0_19, %c3, %c0_20], %31 {strides = array<i32>} : memref<8x4x64xf32, #tpu.memory_space<vmem>>, vector<8x1x32xf32>,
    %c1_21 = arith.constant 1 : index
    %c0_22 = arith.constant 0 : index
    %c0_23 = arith.constant 0 : index
    %32 = vector.load %arg1[%c1_21, %c0_22, %c0_23] : memref<2x8x16xf32, #tpu.memory_space<vmem>>, vector<1x8x16xf32>
    %33 = vector.shape_cast %32 : vector<1x8x16xf32> to vector<8x16xf32>
    %34 = arith.truncf %33 : vector<8x16xf32> to vector<8x16xbf16>
    %cst_24 = arith.constant dense<0.000000e+00> : vector<8x32xf32>
    %35 = tpu.matmul %34, %0, %cst_24 {dimension_numbers = #tpu.dot_dimension_numbers<[1], [0], [0], [1], [0, 0, 1, 1], [], []>} : vector<8x16xbf16>, vector<16x32xbf16>, vector<8x32xf32> -> vector<8x32xf32>
    %36 = vector.broadcast %2 : vector<1x32xf32> to vector<8x32xf32>
    %37 = arith.addf %35, %36 : vector<8x32xf32>
    %cst_25 = arith.constant 0.000000e+00 : f32
    %38 = vector.broadcast %cst_25 : f32 to vector<8x32xf32>
    %39 = arith.maximumf %37, %38 : vector<8x32xf32>
    %40 = arith.truncf %39 : vector<8x32xf32> to vector<8x32xbf16>
    %cst_26 = arith.constant dense<0.000000e+00> : vector<8x128xf32>
    %41 = tpu.matmul %40, %1, %cst_26 {dimension_numbers = #tpu.dot_dimension_numbers<[1], [0], [0], [1], [0, 0, 1, 1], [], []>} : vector<8x32xbf16>, vector<32x128xbf16>, vector<8x128xf32> -> vector<8x128xf32>
    %42 = vector.broadcast %3 : vector<1x128xf32> to vector<8x128xf32>
    %43 = arith.addf %41, %42 : vector<8x128xf32>
    %44 = vector.extract_strided_slice %43 {offsets = [0, 0], sizes = [8, 32], strides = [1, 1]} : vector<8x128xf32> to vector<8x32xf32>
    %c0_27 = arith.constant 0 : index
    %c0_28 = arith.constant 0 : index
    %c32 = arith.constant 32 : index
    %45 = vector.load %arg6[%c0_27, %c0_28, %c32] : memref<8x4x64xf32, #tpu.memory_space<vmem>>, vector<8x1x32xf32>
    %46 = vector.shape_cast %45 : vector<8x1x32xf32> to vector<8x32xf32>
    %47 = vector.shape_cast %44 : vector<8x32xf32> to vector<8x1x32xf32>
    tpu.vector_store %arg6[%c0_27, %c0_28, %c32], %47 {strides = array<i32>} : memref<8x4x64xf32, #tpu.memory_space<vmem>>, vector<8x1x32xf32>,
    %48 = vector.extract_strided_slice %43 {offsets = [0, 32], sizes = [8, 32], strides = [1, 1]} : vector<8x128xf32> to vector<8x32xf32>
    %c0_29 = arith.constant 0 : index
    %c1_30 = arith.constant 1 : index
    %c32_31 = arith.constant 32 : index
    %49 = vector.load %arg6[%c0_29, %c1_30, %c32_31] : memref<8x4x64xf32, #tpu.memory_space<vmem>>, vector<8x1x32xf32>
    %50 = vector.shape_cast %49 : vector<8x1x32xf32> to vector<8x32xf32>
    %51 = vector.shape_cast %48 : vector<8x32xf32> to vector<8x1x32xf32>
    tpu.vector_store %arg6[%c0_29, %c1_30, %c32_31], %51 {strides = array<i32>} : memref<8x4x64xf32, #tpu.memory_space<vmem>>, vector<8x1x32xf32>,
    %52 = vector.extract_strided_slice %43 {offsets = [0, 64], sizes = [8, 32], strides = [1, 1]} : vector<8x128xf32> to vector<8x32xf32>
    %c0_32 = arith.constant 0 : index
    %c2_33 = arith.constant 2 : index
    %c32_34 = arith.constant 32 : index
    %53 = vector.load %arg6[%c0_32, %c2_33, %c32_34] : memref<8x4x64xf32, #tpu.memory_space<vmem>>, vector<8x1x32xf32>
    %54 = vector.shape_cast %53 : vector<8x1x32xf32> to vector<8x32xf32>
    %55 = vector.shape_cast %52 : vector<8x32xf32> to vector<8x1x32xf32>
    tpu.vector_store %arg6[%c0_32, %c2_33, %c32_34], %55 {strides = array<i32>} : memref<8x4x64xf32, #tpu.memory_space<vmem>>, vector<8x1x32xf32>,
    %56 = vector.extract_strided_slice %43 {offsets = [0, 96], sizes = [8, 32], strides = [1, 1]} : vector<8x128xf32> to vector<8x32xf32>
    %c0_35 = arith.constant 0 : index
    %c3_36 = arith.constant 3 : index
    %c32_37 = arith.constant 32 : index
    %57 = vector.load %arg6[%c0_35, %c3_36, %c32_37] : memref<8x4x64xf32, #tpu.memory_space<vmem>>, vector<8x1x32xf32>
    %58 = vector.shape_cast %57 : vector<8x1x32xf32> to vector<8x32xf32>
    %59 = vector.shape_cast %56 : vector<8x32xf32> to vector<8x1x32xf32>
    tpu.vector_store %arg6[%c0_35, %c3_36, %c32_37], %59 {strides = array<i32>} : memref<8x4x64xf32, #tpu.memory_space<vmem>>, vector<8x1x32xf32>,
    return
  }
  func.func @transform_0(%arg0: i32) -> (i32, i32, i32) {
    %c0_i32 = arith.constant 0 : i32
    %c0_i32_0 = arith.constant 0 : i32
    %c0_i32_1 = arith.constant 0 : i32
    return %c0_i32, %arg0, %c0_i32_0 : i32, i32, i32
  }
  func.func @transform_1(%arg0: i32) -> (i32, i32) {
    %c0_i32 = arith.constant 0 : i32
    %c0_i32_0 = arith.constant 0 : i32
    %c0_i32_1 = arith.constant 0 : i32
    return %c0_i32, %c0_i32_0 : i32, i32
  }
  func.func @transform_2(%arg0: i32) -> (i32, i32) {
    %c0_i32 = arith.constant 0 : i32
    %c0_i32_0 = arith.constant 0 : i32
    %c0_i32_1 = arith.constant 0 : i32
    return %c0_i32, %c0_i32_0 : i32, i32
  }
  func.func @transform_3(%arg0: i32) -> (i32, i32) {
    %c0_i32 = arith.constant 0 : i32
    %c0_i32_0 = arith.constant 0 : i32
    %c0_i32_1 = arith.constant 0 : i32
    return %c0_i32, %c0_i32_0 : i32, i32
  }
  func.func @transform_4(%arg0: i32) -> (i32, i32) {
    %c0_i32 = arith.constant 0 : i32
    %c0_i32_0 = arith.constant 0 : i32
    %c0_i32_1 = arith.constant 0 : i32
    return %c0_i32, %c0_i32_0 : i32, i32
  }
  func.func @transform_5(%arg0: i32) -> (i32, i32, i32) {
    %c0_i32 = arith.constant 0 : i32
    %c0_i32_0 = arith.constant 0 : i32
    %c0_i32_1 = arith.constant 0 : i32
    return %arg0, %c0_i32, %c0_i32_0 : i32, i32, i32
  }
}

</mosaic_0001>

<bundles_post_ra>
// kernel: tpu_custom_call.1
= control target key start
LH: loop header
LB: loop body
LE: loop exit
PB: predicated region body
PF: predicated region fallthrough
CT: control target
= control target key end

     0   :  { %10 = vsyncpa [#allocation3], 0  ;;  %s1115_s0 = inlined_call_operand.hbm [shape: f32[2,8,16], index: 0, kind: input, shape index: {}]   ;;  %s1116_s1 = inlined_call_operand.hbm [shape: bf16[16,32], index: 1, kind: input, shape index: {}]   ;;  %s1117_s2 = inlined_call_operand.vmem [shape: f32[1,32], index: 2, kind: input, shape index: {}]   ;;  %s1118_s3 = inlined_call_operand.hbm [shape: bf16[32,128], index: 3, kind: input, shape index: {}]   ;;  %s1119_s4 = inlined_call_operand.vmem [shape: f32[1,128], index: 4, kind: input, shape index: {}]   ;;  %s1120_s5 = inlined_call_operand.hbm [shape: f32[8,4,64], index: 5, kind: output, shape index: {}]  }
   0x1   :  { %11 = vsyncpa [#allocation6], 0 }
   0x2   :  { %12 = vsyncpa [#allocation4], 0  ;;  %s849_s18 = smov [#allocation5]   ;;  %s755_s22 = scalar_lea.hbm %s1116_s1, 128 }
   0x3   :  { %s30_s19 = sshll.u32 %s849_s18, 4  ;;  %p756_p0 = scmp.ne.s32.totalorder %s1116_s1, %s755_s22  ;;  %s31_s19 = int_to_ptr.vmem [resolvable:$true] %s30_s19 }
   0x4   :  { %p759_p1 = scmp.lt.u32.totalorder %s755_s22, %s1116_s1 }
   0x6   :  { %p761_p2 = pnand %p759_p1, %p756_p0 }
   0x8   :  { %764 = shalt.err (!%p761_p2)
}
   0x9   :  { %s765_s27 = scalar_lea.vmem %s31_s19, 128  ;;  %p770_p4 = scmp.lt.s32.totalorder %s31_s19, %s31_s19 }
   0xa   :  { %p766_p3 = scmp.ne.s32.totalorder %s31_s19, %s765_s27  ;;  %p771_p5 = scmp.lt.s32.totalorder %s765_s27, %s765_s27 }
   0xc   :  { %p772_p6 = por %p771_p5, %p770_p4 }
   0xe   :  { %p773_p7 = pnand %p772_p6, %p766_p3 }
  0x10   :  { %776 = shalt.err (!%p773_p7)
}
  0x11   :  { %s850_s28 = smov 64   ;;  %s851_s29 = smov 4  }
  0x12   :  { %36 = dma.hbm_to_vmem [thread:$0]  %s1116_s1, 128, %s31_s19, [#allocation6], %s850_s28, %s850_s28, %s851_s29  }
  0x13   :  { %s852_s7 = smov [#allocation2]   ;;  %s777_s11 = scalar_lea.hbm %s1115_s0, 256 }
  0x14   :  { %s18_s8 = sshll.u32 %s852_s7, 4  ;;  %p778_p8 = scmp.ne.s32.totalorder %s1115_s0, %s777_s11  ;;  %s19_s8 = int_to_ptr.vmem [resolvable:$true] %s18_s8 }
  0x15   :  { %p781_p9 = scmp.lt.u32.totalorder %s777_s11, %s1115_s0 }
  0x17   :  { %p783_p10 = pnand %p781_p9, %p778_p8 }
  0x19   :  { %786 = shalt.err (!%p783_p10)
}
  0x1a   :  { %s787_s16 = scalar_lea.vmem %s19_s8, 256  ;;  %p792_p12 = scmp.lt.s32.totalorder %s19_s8, %s19_s8 }
  0x1b   :  { %p788_p11 = scmp.ne.s32.totalorder %s19_s8, %s787_s16  ;;  %p793_p13 = scmp.lt.s32.totalorder %s787_s16, %s787_s16 }
  0x1d   :  { %p794_p0 = por %p793_p13, %p792_p12 }
  0x1f   :  { %p795_p1 = pnand %p794_p0, %p788_p11 }
  0x21   :  { %798 = shalt.err (!%p795_p1)
}
  0x22   :  { %s853_s1 = smov 128   ;;  %s854_s17 = smov 8  }
  0x23   :  { %24 = dma.hbm_to_vmem [thread:$0]  %s1115_s0, 256, %s19_s8, [#allocation3], %s853_s1, %s853_s1, %s854_s17  }
  0x24   :  { %s855_s20 = smov [#allocation7]   ;;  %s799_s24 = scalar_lea.hbm %s1118_s3, 256 }
  0x25   :  { %s44_s21 = sshll.u32 %s855_s20, 4  ;;  %p800_p2 = scmp.ne.s32.totalorder %s1118_s3, %s799_s24  ;;  %s45_s21 = int_to_ptr.vmem [resolvable:$true] %s44_s21 }
  0x26   :  { %p803_p3 = scmp.lt.u32.totalorder %s799_s24, %s1118_s3 }
  0x28   :  { %p805_p4 = pnand %p803_p3, %p800_p2 }
  0x2a   :  { %808 = shalt.err (!%p805_p4)
}
  0x2b   :  { %s809_s6 = scalar_lea.vmem %s45_s21, 256  ;;  %p814_p6 = scmp.lt.s32.totalorder %s45_s21, %s45_s21 }
  0x2c   :  { %p810_p5 = scmp.ne.s32.totalorder %s45_s21, %s809_s6  ;;  %p815_p7 = scmp.lt.s32.totalorder %s809_s6, %s809_s6 }
  0x2e   :  { %p816_p8 = por %p815_p7, %p814_p6 }
  0x30   :  { %p817_p9 = pnand %p816_p8, %p810_p5 }
  0x32   :  { %820 = shalt.err (!%p817_p9)
}
  0x33   :  { %50 = dma.hbm_to_vmem [thread:$0]  %s1118_s3, 256, %s45_s21, [#allocation6], %s850_s28, %s850_s28, %s851_s29  }
  0x34   :  { %843 = dma.done.wait [#allocation3], 256  }
  0x35   :  { %844 = vsyncadd [#allocation3], 4294967040 }
  0x36   :  { %845 = dma.done.wait [#allocation6], 384  }
  0x37   :  { %846 = vsyncadd [#allocation6], 4294966912  ;;  %v856_v0 = vmov 0.0   ;;  %vm857_vm0 = vmmov 0   ;;  %v752_v1 = vld [vmem:[#allocation5] sm:$0xff]   ;;  %v71_v2 = vld [vmem:[#allocation2] sm:$0xff]  ;;  %v198_v25 = vlaneseq }
  0x38   :  { %711 = vmatprep.subr.bf16.mxu0 %v856_v0  ;;  %713 = vmatprep.mubr.msk.bf16.mxu0 %vm857_vm0, %v856_v0  ;;  %vm85_vm1 = vcmask 130048   ;;  %v72_v3 = vpack.c.bf16 %v71_v2, %v71_v2  ;;  %v389_v4 = vld [vmem:[#allocation2 + $0x8] sm:$0xff]  ;;  %v753_v6 = vld [vmem:[#allocation7] sm:$0xff]   ;;  %v754_v7 = vld [vmem:[#allocation7 + $0x8] sm:$0xff]   ;;  %vm149_vm2 = vcmask 261120   ;;  %vm251_vm3 = vcmask 253952  }
  0x39   :  { %717 = vmatprep.subr.bf16.mxu1 %v856_v0  ;;  %721 = vmatprep.mubr.msk.bf16.mxu1 %vm857_vm0, %v856_v0  ;;  %v390_v5 = vpack.c.bf16 %v389_v4, %v389_v4  ;;  %v692_v8 = vld [vmem:[%s1117_s2] ss:$0 sm:$0xff]  ;;  %v858_v23 = vmov 1966171168   ;;  %v199_v27 = vshrl.u32 %v198_v25, 7  ;;  %s860_s10 = smov 32  }
  0x3a   :  { %712 = vmatpush3.bf16.msra.mxu0 %v752_v1  ;;  %718 = vmatpush3.bf16.msra.mxu1 %v753_v6  ;;  %v196_v24 = vunpack.c.l.s4 %v858_v23  ;;  %v695_v28 = vld [vmem:[%s1119_s4] ss:$0 sm:$0xff]  ;;  %s859_s4 = smov 96   ;;  %vm585_vm4 = vcmask 516352   ;;  %s861_s11 = smov [#allocation8]  }
  0x3b   :  { %725 = vmatprep.subr.bf16.mxu0 %v856_v0  ;;  %719 = vmatprep.subr.bf16.mxu1 %v856_v0  ;;  %v947_v36 = vsub.s32 0, %v199_v27  ;;  %s679_s12 = sshll.u32 %s861_s11, 4  ;;  %s680_s12 = int_to_ptr.vmem [resolvable:$true] %s679_s12 }
  0x3c   :  { %v197_v26 = vunpack.c.0.s8 %v196_v24  ;;  %s821_s13 = scalar_lea.vmem %s680_s12, 512  ;;  %p826_p11 = scmp.lt.s32.totalorder %s680_s12, %s680_s12 }
  0x3d   :  { %714 = vmatmul.mubr.msk.bf16.vlgmr.msra.gmra.mrb[0].mxu0 %vm85_vm1, %v72_v3  ;;  %p822_p10 = scmp.ne.s32.totalorder %s680_s12, %s821_s13  ;;  %p827_p12 = scmp.lt.s32.totalorder %s821_s13, %s821_s13 }
  0x3e   :  { %726 = vmatpush3.bf16.msra.mxu0 %v752_v1  ;;  %727 = vmatprep.mubr.msk.bf16.mxu0 %vm857_vm0, %v856_v0  ;;  %v944_v29 = vsub.s32 %v197_v26, %v199_v27 }
  0x3f   :  { %720 = vmatpush3.bf16.msra.mxu1 %v754_v7  ;;  %p828_p13 = por %p827_p12, %p826_p11 }
  0x40   :  { %731 = vmatprep.subr.bf16.mxu1 %v856_v0 }
  0x41   :  { %p829_p0 = pnand %p828_p13, %p822_p10 }
  0x45   :  { %728 = vmatmul.mubr.msk.bf16.vlgmr.msra.gmra.mrb[4].mxu0 %vm85_vm1, %v390_v5 }
 0x110   :  { %v123_v9 = vpop.f32.mrb[0].mxu0 }
 0x111   :  { %v124_v10 = vadd.f32 %v692_v8, %v123_v9  ;;  %v715_v11 = vpop.f32.mrb[1].mxu0 }
 0x112   :  { %v126_v12 = vpop.f32.mrb[2].mxu0 }
 0x113   :  { %v129_v13 = vmax.f32 %v124_v10, 0.0  ;;  %v716_v14 = vpop.f32.mrb[3].mxu0 }
 0x115   :  { %v130_v15 = vpack.c.bf16 %v129_v13, %v129_v13 }
 0x117   :  { %722 = vmatmul.mubr.msk.bf16.vlgmr.msra.gmra.mrb[0].mxu1 %vm149_vm2, %v130_v15 }
 0x118   :  { %v428_v16 = vpop.f32.mrb[4].mxu0  ;;  %732 = vmatpush3.bf16.msra.mxu1 %v753_v6  ;;  %735 = vmatprep.mubr.msk.bf16.mxu1 %vm857_vm0, %v856_v0 }
 0x119   :  { %v429_v17 = vadd.f32 %v692_v8, %v428_v16  ;;  %v729_v18 = vpop.f32.mrb[5].mxu0  ;;  %733 = vmatprep.subr.bf16.mxu1 %v856_v0 }
 0x11a   :  { %v431_v19 = vpop.f32.mrb[6].mxu0 }
 0x11b   :  { %v434_v20 = vmax.f32 %v429_v17, 0.0  ;;  %v730_v21 = vpop.f32.mrb[7].mxu0 }
 0x11c   :  { %734 = vmatpush3.bf16.msra.mxu1 %v754_v7 }
 0x11d   :  { %v435_v22 = vpack.c.bf16 %v434_v20, %v434_v20 }
 0x11f   :  { %736 = vmatmul.mubr.msk.bf16.vlgmr.msra.gmra.mrb[4].mxu1 %vm149_vm2, %v435_v22 }
 0x1ea   :  { %v187_v30 = vpop.f32.mrb[0].mxu1 }
 0x1eb   :  { %v188_v31 = vadd.f32 %v695_v28, %v187_v30  ;;  %v723_v32 = vpop.f32.mrb[1].mxu1 }
 0x1ec   :  { %v190_v33 = vpop.f32.mrb[2].mxu1 }
 0x1ed   :  { %v194_v34 = vcombine.high %v188_v31, %v188_v31  ;;  %v201_v35 = vrot.slane %v188_v31, %v944_v29  ;;  %v724_v37 = vpop.f32.mrb[3].mxu1 }
 0x1ef   :  { %v208_v38 = vrot.slane %v194_v34, %v944_v29  ;;  %v209_v39 = vcombine.high %v201_v35, %v201_v35  ;;  %v217_v40 = vrot.slane %v201_v35, %v944_v29 }
 0x1f1   :  { %v210_v41 = vcombine.high %v208_v38, %v208_v38  ;;  %v224_v42 = vrot.slane %v208_v38, %v944_v29  ;;  %v231_v43 = vrot.slane %v209_v39, %v944_v29  ;;  %v263_v44 = vrot.slane %v217_v40, %v947_v36  ;;  %252 = vst.msk [vmem:[#allocation8] sm:$0x1] %vm251_vm3, %v217_v40 }
 0x1f2   :  { %v239_v45 = vcombine.high %v217_v40, %v217_v40  ;;  %v473_v46 = vpop.f32.mrb[4].mxu1 }
 0x1f3   :  { %292 = vrot.lane.b32.xlu0 %v263_v44, %s859_s4  ;;  %v241_v47 = vcombine.high %v231_v43, %v231_v43  ;;  %v238_v48 = vrot.slane %v210_v41, %v944_v29  ;;  %v737_v49 = vpop.f32.mrb[5].mxu1  ;;  %253 = vst.msk [vmem:[#allocation8 + $0x4] sm:$0x1] %vm251_vm3, %v231_v43  ;;  %256 = vst.msk [vmem:[#allocation8 + $0x10] sm:$0x1] %vm251_vm3, %v224_v42  ;;  %v240_v51 = vcombine.high %v224_v42, %v224_v42 }
 0x1f4   :  { %v271_v50 = vrot.slane %v239_v45, %v947_v36  ;;  %v474_v52 = vadd.f32 %v695_v28, %v473_v46  ;;  %v476_v53 = vpop.f32.mrb[6].mxu1  ;;  %254 = vst.msk [vmem:[#allocation8 + $0x8] sm:$0x1] %vm251_vm3, %v239_v45  ;;  %v267_v57 = vrot.slane %v231_v43, %v947_v36  ;;  %v279_v63 = vrot.slane %v224_v42, %v947_v36 }
 0x1f5   :  { %v242_v54 = vcombine.high %v238_v48, %v238_v48  ;;  %v738_v55 = vpop.f32.mrb[7].mxu1  ;;  %255 = vst.msk [vmem:[#allocation8 + $0xc] sm:$0x1] %vm251_vm3, %v241_v47  ;;  %257 = vst.msk [vmem:[#allocation8 + $0x14] sm:$0x1] %vm251_vm3, %v238_v48  ;;  %v275_v62 = vrot.slane %v241_v47, %v947_v36  ;;  %v283_v0 = vrot.slane %v238_v48, %v947_v36 }
 0x1f6   :  { %296 = vrot.lane.b32.xlu1 %v271_v50, %s859_s4  ;;  %v480_v56 = vcombine.high %v474_v52, %v474_v52  ;;  %258 = vst.msk [vmem:[#allocation8 + $0x18] sm:$0x1] %vm251_vm3, %v240_v51  ;;  %v287_v1 = vrot.slane %v240_v51, %v947_v36  ;;  %v487_v2 = vrot.slane %v474_v52, %v944_v29 }
 0x1f7   :  { %324 = vrot.lane.b32.xlu0 %v263_v44, %s850_s28  ;;  %259 = vst.msk [vmem:[#allocation8 + $0x1c] sm:$0x1] %vm251_vm3, %v242_v54  ;;  %v291_v3 = vrot.slane %v242_v54, %v947_v36 }
 0x1f8   :  { %v494_v58 = vrot.slane %v480_v56, %v944_v29  ;;  %v495_v4 = vcombine.high %v487_v2, %v487_v2  ;;  %v503_v5 = vrot.slane %v487_v2, %v944_v29 }
 0x1fa   :  { %326 = vrot.lane.b32.xlu1 %v267_v57, %s850_s28  ;;  %v496_v59 = vcombine.high %v494_v58, %v494_v58  ;;  %v971_v60 = vrot.slane %v494_v58, %v944_v29  ;;  %v517_v6 = vrot.slane %v495_v4, %v944_v29  ;;  %v532_v7 = vrot.slane %v503_v5, %v947_v36 }
 0x1fb   :  { %356 = vrot.lane.b32.xlu0 %v263_v44, %s860_s10  ;;  %v525_v9 = vcombine.high %v503_v5, %v503_v5 }
 0x1fc   :  { %v975_v61 = vrot.slane %v496_v59, %v944_v29  ;;  %v536_v8 = vrot.slane %v517_v6, %v947_v36  ;;  %v527_v10 = vcombine.high %v517_v6, %v517_v6  ;;  %v548_v13 = vrot.slane %v971_v60, %v947_v36 }
 0x1fd   :  { %v540_v11 = vrot.slane %v525_v9, %v947_v36  ;;  %v526_v15 = vcombine.high %v971_v60, %v971_v60 }
 0x1fe   :  { %358 = vrot.lane.b32.xlu1 %v267_v57, %s860_s10  ;;  %v544_v12 = vrot.slane %v527_v10, %v947_v36  ;;  %v552_v14 = vrot.slane %v975_v61, %v947_v36  ;;  %v528_v16 = vcombine.high %v975_v61, %v975_v61 }
 0x1ff   :  { %294 = vrot.lane.b32.xlu0 %v267_v57, %s859_s4  ;;  %v556_v17 = vrot.slane %v526_v15, %v947_v36 }
 0x200   :  { %v560_v18 = vrot.slane %v528_v16, %v947_v36 }
 0x202   :  { %298 = vrot.lane.b32.xlu1 %v275_v62, %s859_s4 }
 0x203   :  { %300 = vrot.lane.b32.xlu0 %v279_v63, %s859_s4 }
 0x206   :  { %302 = vrot.lane.b32.xlu1 %v283_v0, %s859_s4 }
 0x207   :  { %328 = vrot.lane.b32.xlu0 %v271_v50, %s850_s28 }
 0x20a   :  { %330 = vrot.lane.b32.xlu1 %v275_v62, %s850_s28 }
 0x20b   :  { %332 = vrot.lane.b32.xlu0 %v279_v63, %s850_s28 }
 0x20e   :  { %334 = vrot.lane.b32.xlu1 %v283_v0, %s850_s28 }
 0x20f   :  { %360 = vrot.lane.b32.xlu0 %v271_v50, %s860_s10 }
 0x212   :  { %362 = vrot.lane.b32.xlu1 %v275_v62, %s860_s10 }
 0x213   :  { %364 = vrot.lane.b32.xlu0 %v279_v63, %s860_s10 }
 0x216   :  { %366 = vrot.lane.b32.xlu1 %v283_v0, %s860_s10 }
 0x217   :  { %304 = vrot.lane.b32.xlu0 %v287_v1, %s859_s4 }
 0x21a   :  { %306 = vrot.lane.b32.xlu1 %v291_v3, %s859_s4 }
 0x21b   :  { %336 = vrot.lane.b32.xlu0 %v287_v1, %s850_s28 }
 0x21e   :  { %338 = vrot.lane.b32.xlu1 %v291_v3, %s850_s28 }
 0x21f   :  { %368 = vrot.lane.b32.xlu0 %v287_v1, %s860_s10 }
 0x222   :  { %370 = vrot.lane.b32.xlu1 %v291_v3, %s860_s10 }
 0x223   :  { %561 = vrot.lane.b32.xlu0 %v532_v7, %s860_s10 }
 0x226   :  { %563 = vrot.lane.b32.xlu1 %v536_v8, %s860_s10 }
 0x227   :  { %610 = vrot.lane.b32.xlu0 %v532_v7, %s859_s4 }
 0x22a   :  { %612 = vrot.lane.b32.xlu1 %v536_v8, %s859_s4 }
 0x22b   :  { %642 = vrot.lane.b32.xlu0 %v532_v7, %s850_s28 }
 0x22e   :  { %644 = vrot.lane.b32.xlu1 %v536_v8, %s850_s28 }
 0x22f   :  { %565 = vrot.lane.b32.xlu0 %v540_v11, %s860_s10 }
 0x232   :  { %567 = vrot.lane.b32.xlu1 %v544_v12, %s860_s10 }
 0x233   :  { %569 = vrot.lane.b32.xlu0 %v548_v13, %s860_s10 }
 0x236   :  { %571 = vrot.lane.b32.xlu1 %v552_v14, %s860_s10 }
 0x237   :  { %614 = vrot.lane.b32.xlu0 %v540_v11, %s859_s4 }
 0x23a   :  { %616 = vrot.lane.b32.xlu1 %v544_v12, %s859_s4 }
 0x23b   :  { %618 = vrot.lane.b32.xlu0 %v548_v13, %s859_s4 }
 0x23e   :  { %620 = vrot.lane.b32.xlu1 %v552_v14, %s859_s4 }
 0x23f   :  { %646 = vrot.lane.b32.xlu0 %v540_v11, %s850_s28 }
 0x242   :  { %648 = vrot.lane.b32.xlu1 %v544_v12, %s850_s28 }
 0x243   :  { %650 = vrot.lane.b32.xlu0 %v548_v13, %s850_s28 }
 0x246   :  { %652 = vrot.lane.b32.xlu1 %v552_v14, %s850_s28 }
 0x247   :  { %573 = vrot.lane.b32.xlu0 %v556_v17, %s860_s10 }
 0x24a   :  { %575 = vrot.lane.b32.xlu1 %v560_v18, %s860_s10 }
 0x24b   :  { %622 = vrot.lane.b32.xlu0 %v556_v17, %s859_s4 }
 0x24e   :  { %624 = vrot.lane.b32.xlu1 %v560_v18, %s859_s4 }
 0x24f   :  { %654 = vrot.lane.b32.xlu0 %v556_v17, %s850_s28 }
 0x252   :  { %656 = vrot.lane.b32.xlu1 %v560_v18, %s850_s28 }
 0x265   :  { %v293_v19 = vpop.permute.xlu0 %292 }
 0x266   :  { %316 = vst.msk [vmem:[#allocation8 + $0x1] sm:$0x1] %vm251_vm3, %v293_v19 }
 0x267   :  { %602 = vst.msk [vmem:[#allocation8 + $0x1] sm:$0x1] %vm585_vm4, %v503_v5 }
 0x268   :  { %v297_v20 = vpop.permute.xlu1 %296 }
 0x269   :  { %318 = vst.msk [vmem:[#allocation8 + $0x9] sm:$0x1] %vm251_vm3, %v297_v20  ;;  %v325_v21 = vpop.permute.xlu0 %324 }
 0x26a   :  { %604 = vst.msk [vmem:[#allocation8 + $0x9] sm:$0x1] %vm585_vm4, %v525_v9 }
 0x26b   :  { %348 = vst.msk [vmem:[#allocation8 + $0x2] sm:$0x1] %vm251_vm3, %v325_v21 }
 0x26c   :  { %v327_v22 = vpop.permute.xlu1 %326 }
 0x26d   :  { %349 = vst.msk [vmem:[#allocation8 + $0x6] sm:$0x1] %vm251_vm3, %v327_v22  ;;  %v357_v23 = vpop.permute.xlu0 %356 }
 0x26e   :  { %380 = vst.msk [vmem:[#allocation8 + $0x3] sm:$0x1] %vm251_vm3, %v357_v23 }
 0x270   :  { %v359_v24 = vpop.permute.xlu1 %358 }
 0x271   :  { %381 = vst.msk [vmem:[#allocation8 + $0x7] sm:$0x1] %vm251_vm3, %v359_v24  ;;  %v295_v25 = vpop.permute.xlu0 %294 }
 0x272   :  { %317 = vst.msk [vmem:[#allocation8 + $0x5] sm:$0x1] %vm251_vm3, %v295_v25 }
 0x273   :  { %603 = vst.msk [vmem:[#allocation8 + $0x5] sm:$0x1] %vm585_vm4, %v517_v6 }
 0x274   :  { %v299_v26 = vpop.permute.xlu1 %298 }
 0x275   :  { %319 = vst.msk [vmem:[#allocation8 + $0xd] sm:$0x1] %vm251_vm3, %v299_v26  ;;  %v301_v27 = vpop.permute.xlu0 %300 }
 0x276   :  { %605 = vst.msk [vmem:[#allocation8 + $0xd] sm:$0x1] %vm585_vm4, %v527_v10 }
 0x277   :  { %320 = vst.msk [vmem:[#allocation8 + $0x11] sm:$0x1] %vm251_vm3, %v301_v27 }
 0x278   :  { %606 = vst.msk [vmem:[#allocation8 + $0x11] sm:$0x1] %vm585_vm4, %v971_v60  ;;  %v303_v28 = vpop.permute.xlu1 %302 }
 0x279   :  { %321 = vst.msk [vmem:[#allocation8 + $0x15] sm:$0x1] %vm251_vm3, %v303_v28  ;;  %v329_v29 = vpop.permute.xlu0 %328 }
 0x27a   :  { %607 = vst.msk [vmem:[#allocation8 + $0x15] sm:$0x1] %vm585_vm4, %v975_v61 }
 0x27b   :  { %350 = vst.msk [vmem:[#allocation8 + $0xa] sm:$0x1] %vm251_vm3, %v329_v29 }
 0x27c   :  { %v331_v30 = vpop.permute.xlu1 %330 }
 0x27d   :  { %351 = vst.msk [vmem:[#allocation8 + $0xe] sm:$0x1] %vm251_vm3, %v331_v30  ;;  %v333_v31 = vpop.permute.xlu0 %332 }
 0x27e   :  { %352 = vst.msk [vmem:[#allocation8 + $0x12] sm:$0x1] %vm251_vm3, %v333_v31 }
 0x280   :  { %v335_v32 = vpop.permute.xlu1 %334 }
 0x281   :  { %353 = vst.msk [vmem:[#allocation8 + $0x16] sm:$0x1] %vm251_vm3, %v335_v32  ;;  %v361_v33 = vpop.permute.xlu0 %360 }
 0x282   :  { %382 = vst.msk [vmem:[#allocation8 + $0xb] sm:$0x1] %vm251_vm3, %v361_v33 }
 0x284   :  { %v363_v34 = vpop.permute.xlu1 %362 }
 0x285   :  { %383 = vst.msk [vmem:[#allocation8 + $0xf] sm:$0x1] %vm251_vm3, %v363_v34  ;;  %v365_v35 = vpop.permute.xlu0 %364 }
 0x286   :  { %384 = vst.msk [vmem:[#allocation8 + $0x13] sm:$0x1] %vm251_vm3, %v365_v35 }
 0x288   :  { %v367_v36 = vpop.permute.xlu1 %366 }
 0x289   :  { %385 = vst.msk [vmem:[#allocation8 + $0x17] sm:$0x1] %vm251_vm3, %v367_v36  ;;  %v305_v37 = vpop.permute.xlu0 %304 }
 0x28a   :  { %322 = vst.msk [vmem:[#allocation8 + $0x19] sm:$0x1] %vm251_vm3, %v305_v37 }
 0x28b   :  { %608 = vst.msk [vmem:[#allocation8 + $0x19] sm:$0x1] %vm585_vm4, %v526_v15 }
 0x28c   :  { %v307_v38 = vpop.permute.xlu1 %306 }
 0x28d   :  { %323 = vst.msk [vmem:[#allocation8 + $0x1d] sm:$0x1] %vm251_vm3, %v307_v38  ;;  %v337_v39 = vpop.permute.xlu0 %336 }
 0x28e   :  { %609 = vst.msk [vmem:[#allocation8 + $0x1d] sm:$0x1] %vm585_vm4, %v528_v16 }
 0x28f   :  { %354 = vst.msk [vmem:[#allocation8 + $0x1a] sm:$0x1] %vm251_vm3, %v337_v39 }
 0x290   :  { %v339_v40 = vpop.permute.xlu1 %338 }
 0x291   :  { %355 = vst.msk [vmem:[#allocation8 + $0x1e] sm:$0x1] %vm251_vm3, %v339_v40  ;;  %v369_v41 = vpop.permute.xlu0 %368 }
 0x292   :  { %386 = vst.msk [vmem:[#allocation8 + $0x1b] sm:$0x1] %vm251_vm3, %v369_v41 }
 0x294   :  { %v371_v42 = vpop.permute.xlu1 %370 }
 0x295   :  { %387 = vst.msk [vmem:[#allocation8 + $0x1f] sm:$0x1] %vm251_vm3, %v371_v42  ;;  %v562_v43 = vpop.permute.xlu0 %561 }
 0x296   :  { %586 = vst.msk [vmem:[#allocation8] sm:$0x1] %vm585_vm4, %v562_v43 }
 0x298   :  { %v564_v44 = vpop.permute.xlu1 %563 }
 0x299   :  { %587 = vst.msk [vmem:[#allocation8 + $0x4] sm:$0x1] %vm585_vm4, %v564_v44  ;;  %v611_v45 = vpop.permute.xlu0 %610 }
 0x29a   :  { %634 = vst.msk [vmem:[#allocation8 + $0x2] sm:$0x1] %vm585_vm4, %v611_v45 }
 0x29c   :  { %v613_v46 = vpop.permute.xlu1 %612 }
 0x29d   :  { %635 = vst.msk [vmem:[#allocation8 + $0x6] sm:$0x1] %vm585_vm4, %v613_v46  ;;  %v643_v47 = vpop.permute.xlu0 %642 }
 0x29e   :  { %666 = vst.msk [vmem:[#allocation8 + $0x3] sm:$0x1] %vm585_vm4, %v643_v47 }
 0x2a0   :  { %v645_v48 = vpop.permute.xlu1 %644 }
 0x2a1   :  { %667 = vst.msk [vmem:[#allocation8 + $0x7] sm:$0x1] %vm585_vm4, %v645_v48  ;;  %v566_v49 = vpop.permute.xlu0 %565 }
 0x2a2   :  { %588 = vst.msk [vmem:[#allocation8 + $0x8] sm:$0x1] %vm585_vm4, %v566_v49 }
 0x2a4   :  { %v568_v50 = vpop.permute.xlu1 %567 }
 0x2a5   :  { %589 = vst.msk [vmem:[#allocation8 + $0xc] sm:$0x1] %vm585_vm4, %v568_v50  ;;  %v570_v51 = vpop.permute.xlu0 %569 }
 0x2a6   :  { %590 = vst.msk [vmem:[#allocation8 + $0x10] sm:$0x1] %vm585_vm4, %v570_v51 }
 0x2a8   :  { %v572_v52 = vpop.permute.xlu1 %571 }
 0x2a9   :  { %591 = vst.msk [vmem:[#allocation8 + $0x14] sm:$0x1] %vm585_vm4, %v572_v52  ;;  %v615_v53 = vpop.permute.xlu0 %614 }
 0x2aa   :  { %636 = vst.msk [vmem:[#allocation8 + $0xa] sm:$0x1] %vm585_vm4, %v615_v53 }
 0x2ac   :  { %v617_v54 = vpop.permute.xlu1 %616 }
 0x2ad   :  { %637 = vst.msk [vmem:[#allocation8 + $0xe] sm:$0x1] %vm585_vm4, %v617_v54  ;;  %v619_v55 = vpop.permute.xlu0 %618 }
 0x2ae   :  { %638 = vst.msk [vmem:[#allocation8 + $0x12] sm:$0x1] %vm585_vm4, %v619_v55 }
 0x2b0   :  { %v621_v56 = vpop.permute.xlu1 %620 }
 0x2b1   :  { %639 = vst.msk [vmem:[#allocation8 + $0x16] sm:$0x1] %vm585_vm4, %v621_v56  ;;  %v647_v57 = vpop.permute.xlu0 %646 }
 0x2b2   :  { %668 = vst.msk [vmem:[#allocation8 + $0xb] sm:$0x1] %vm585_vm4, %v647_v57 }
 0x2b4   :  { %v649_v58 = vpop.permute.xlu1 %648 }
 0x2b5   :  { %669 = vst.msk [vmem:[#allocation8 + $0xf] sm:$0x1] %vm585_vm4, %v649_v58  ;;  %v651_v59 = vpop.permute.xlu0 %650 }
 0x2b6   :  { %670 = vst.msk [vmem:[#allocation8 + $0x13] sm:$0x1] %vm585_vm4, %v651_v59 }
 0x2b8   :  { %v653_v60 = vpop.permute.xlu1 %652 }
 0x2b9   :  { %671 = vst.msk [vmem:[#allocation8 + $0x17] sm:$0x1] %vm585_vm4, %v653_v60  ;;  %v574_v61 = vpop.permute.xlu0 %573 }
 0x2ba   :  { %592 = vst.msk [vmem:[#allocation8 + $0x18] sm:$0x1] %vm585_vm4, %v574_v61 }
 0x2bc   :  { %v576_v62 = vpop.permute.xlu1 %575 }
 0x2bd   :  { %593 = vst.msk [vmem:[#allocation8 + $0x1c] sm:$0x1] %vm585_vm4, %v576_v62  ;;  %v623_v63 = vpop.permute.xlu0 %622 }
 0x2be   :  { %640 = vst.msk [vmem:[#allocation8 + $0x1a] sm:$0x1] %vm585_vm4, %v623_v63 }
 0x2c0   :  { %v625_v0 = vpop.permute.xlu1 %624 }
 0x2c1   :  { %641 = vst.msk [vmem:[#allocation8 + $0x1e] sm:$0x1] %vm585_vm4, %v625_v0  ;;  %v655_v1 = vpop.permute.xlu0 %654 }
 0x2c2   :  { %672 = vst.msk [vmem:[#allocation8 + $0x1b] sm:$0x1] %vm585_vm4, %v655_v1 }
 0x2c4   :  { %v657_v2 = vpop.permute.xlu1 %656 }
 0x2c5   :  { %673 = vst.msk [vmem:[#allocation8 + $0x1f] sm:$0x1] %vm585_vm4, %v657_v2 }
 0x2c6   :  { %832 = shalt.err (!%p829_p0)
}
 0x2c7   :  { %s833_s16 = scalar_lea.hbm %s1120_s5, 512 }
 0x2c8   :  { %p834_p1 = scmp.ne.s32.totalorder %s1120_s5, %s833_s16  ;;  %p837_p2 = scmp.lt.u32.totalorder %s833_s16, %s1120_s5 }
 0x2ca   :  { %p839_p3 = pnand %p837_p2, %p834_p1 }
 0x2cc   :  { %842 = shalt.err (!%p839_p3)
}
 0x2cd   :  { %685 = dma.vmem_to_hbm [thread:$0]  %s680_s12, 512, %s1120_s5, [#allocation4], %s850_s28, %s850_s28, %s851_s29  }
 0x2ce   :  { %847 = dma.done.wait [#allocation4], 512  }
 0x2cf   :  { %848 = vsyncadd [#allocation4], 4294966784 }
 0x2d0   :  { %689 = vsyncpa [#allocation3], 1 }
 0x2d1   :  { %690 = vsyncpa [#allocation6], 1 }
 0x2d2   :  { %691 = vsyncpa [#allocation4], 1 }

</bundles_post_ra>
